<compile_context>
chip_gen: v5e
topology: v5e:2x2
jax: 0.10.0
libtpu: 0.0.40
codegen_flags: <defaults>
</compile_context>

<pallas_src>
import functools

import numpy as np

import jax
import jax.numpy as jnp
from jax.experimental import pallas as pl
from jax.experimental.pallas import tpu as pltpu


# ----------------------------------------------------------------------------
# Small helpers
# ----------------------------------------------------------------------------
def _cdiv(a, b):
    return -(-a // b)


def _round_up(x, m):
    return _cdiv(x, m) * m


_MAX_TILE_ROWS = 16384  # hard cap: keeps the (TM,128) f32 epilogue temporaries
                        # comfortably inside a <=40 MiB VMEM budget.


def _pick_tile(n_rows, block_rows, row_align):
    """Row-tile: big enough to amortize the ~0.35us/step overhead, aligned, and
    capped so the grid keeps >=2 steps (so ("parallel",) can use both v7x TCs)."""
    tm = _round_up(min(max(int(block_rows), 1), _MAX_TILE_ROWS), row_align)
    two_step = _round_up(_cdiv(n_rows, 2), row_align)
    return max(row_align, min(tm, two_step))


# ----------------------------------------------------------------------------
# Kernel bodies
# ----------------------------------------------------------------------------
def _waist_activation(h_ref, f_ref, we_ref, be_ref, w1h_ref, w1f_ref, b1_ref):
    """enricher + first Linear of `out`; f32 HBM rows cast to bf16 in-register,
    MXU matmuls with f32 accumulation."""
    cdt = jnp.bfloat16
    h = h_ref[...].astype(cdt)
    f = f_ref[...].astype(cdt)
    # enricher: Linear(F, F) + ReLU
    enr = jnp.dot(f, we_ref[...], preferred_element_type=jnp.float32)
    enr = jnp.maximum(enr + be_ref[...], 0.0).astype(cdt)
    # out[0]: Linear(H + F, waist) on the (virtual) concat, split into parts
    z1 = jnp.dot(h, w1h_ref[...], preferred_element_type=jnp.float32)
    z1 = z1 + jnp.dot(enr, w1f_ref[...], preferred_element_type=jnp.float32)
    # Dropout (eval) -> identity, then ReLU
    return jnp.maximum(z1 + b1_ref[...], 0.0).astype(cdt)


def _concat_combine_kernel_dense(h_ref, f_ref, we_ref, be_ref,
                                 w1h_ref, w1f_ref, b1_ref,
                                 w2t_ref, b2t_ref, keep_ref, o_ref, *, pack):
    """Lane-dense output: o_ref block is (TM//pack, 128); `pack` consecutive
    logical rows are packed into one 128-lane output row (row-major identical)."""
    z1 = _waist_activation(h_ref, f_ref, we_ref, be_ref, w1h_ref, w1f_ref, b1_ref)

    # w2t holds `pack` replicated copies of W2 along lanes, so
    #   y[m, j*out_size + o] == (z1[m] @ W2 + b2)[o]  for every j.
    y = jnp.dot(z1, w2t_ref[...], preferred_element_type=jnp.float32) + b2t_ref[...]

    tm, lanes = y.shape
    # keep_ref[j, l] == 1 iff lane l belongs to packed slot j (precomputed,
    # VMEM-resident — no per-step iota/compare).  jnp.where (replace, not
    # multiply) so NaN/Inf garbage from partial tail blocks cannot leak.
    keep = keep_ref[...] != 0.0
    y3 = y.reshape(tm // pack, pack, lanes)
    packed = jnp.where(keep[None, :, :], y3, 0.0).sum(axis=1)
    o_ref[...] = packed.astype(o_ref.dtype)       # dense 128-lane stores
    # TODO(synk): on v7x, if this epilogue ever binds, switch to the
    # block-diagonal-W2 matmul form (z1 reshaped to (TM/pack, pack*waist))
    # after confirming the reshape does not force a relayout copy.


def _concat_combine_kernel_plain(h_ref, f_ref, we_ref, be_ref,
                                 w1h_ref, w1f_ref, b1_ref,
                                 w2_ref, b2_ref, o_ref):
    """Narrow-store fallback: o_ref block is (TM, out_size) (masked lane stores).
    Kept only behind an explicit flag for debugging / odd out_size."""
    z1 = _waist_activation(h_ref, f_ref, we_ref, be_ref, w1h_ref, w1f_ref, b1_ref)
    y = jnp.dot(z1, w2_ref[...], preferred_element_type=jnp.float32) + b2_ref[...]
    o_ref[...] = y.astype(o_ref.dtype)


# ----------------------------------------------------------------------------
# Wrapper (fully jitted; no host syncs, no try/except fallback)
# ----------------------------------------------------------------------------
@functools.partial(jax.jit, static_argnames=("block_rows", "lane_dense", "out_dtype"))
def concat_combine(hidden, features, params, *, block_rows=8192,
                   lane_dense=None, out_dtype=jnp.float32):
    """hidden: (B, S, H) f32, features: (B, S, F) f32 -> (B, S, out_size)."""
    B, S, H = hidden.shape
    F = features.shape[-1]
    We, be, W1h, W1f, b1, W2, b2 = params
    waist = W1h.shape[1]
    out_size = W2.shape[1]
    N = B * S

    if lane_dense is None:                       # explicit capability check
        lane_dense = (128 % out_size == 0) and (out_size < 128)

    # Inputs stay f32 all the way to the kernel (no extra HBM copy); only the
    # tiny weights are cast here.  Biases stay f32 (added to f32 accumulators).
    h2d = hidden.reshape(N, H)
    f2d = features.reshape(N, F)
    cdt = jnp.bfloat16
    We_c, W1h_c, W1f_c, W2_c = (w.astype(cdt) for w in (We, W1h, W1f, W2))
    be_c, b1_c, b2_c = (b.astype(jnp.float32) for b in (be, b1, b2))

    out_itemsize = jnp.dtype(out_dtype).itemsize
    fix = lambda shape: pl.BlockSpec(shape, lambda i: (0, 0))   # VMEM-resident

    if lane_dense:
        pack = 128 // out_size
        lanes = pack * out_size                  # == 128
        row_align = 8 * pack                     # output block sublanes % 8 == 0
        tm = _pick_tile(N, block_rows, row_align)
        n_out = _cdiv(N, pack)                   # packed output rows
        grid = (_cdiv(n_out, tm // pack),)
        out_blk_rows = tm // pack

        w2_in = jnp.tile(W2_c, (1, pack))        # (waist, 128)
        b2_in = jnp.tile(b2_c, (1, pack))        # (1, 128)
        keep_np = (np.arange(lanes)[None, :] // out_size
                   == np.arange(pack)[:, None]).astype(np.float32)
        keep = jnp.asarray(keep_np)              # (pack, 128), resident

        in_specs = [
            pl.BlockSpec((tm, H), lambda i: (i, 0)),   # hidden rows (pipelined)
            pl.BlockSpec((tm, F), lambda i: (i, 0)),   # feature rows (pipelined)
            fix((F, F)), fix((1, F)),                  # We, be
            fix((H, waist)), fix((F, waist)), fix((1, waist)),  # W1h, W1f, b1
            fix((waist, lanes)), fix((1, lanes)),      # W2 (lane-tiled), b2
            fix((pack, lanes)),                        # keep mask
        ]
        out_spec = pl.BlockSpec((out_blk_rows, lanes), lambda i: (i, 0))
        out_shape = jax.ShapeDtypeStruct((n_out, lanes), out_dtype)
        kernel = functools.partial(_concat_combine_kernel_dense, pack=pack)
        operands = (h2d, f2d, We_c, be_c, W1h_c, W1f_c, b1_c, w2_in, b2_in, keep)
    else:
        pack = 1
        lanes = out_size
        row_align = 8
        tm = _pick_tile(N, block_rows, row_align)
        n_out = N
        grid = (_cdiv(N, tm),)
        out_blk_rows = tm

        in_specs = [
            pl.BlockSpec((tm, H), lambda i: (i, 0)),
            pl.BlockSpec((tm, F), lambda i: (i, 0)),
            fix((F, F)), fix((1, F)),
            fix((H, waist)), fix((F, waist)), fix((1, waist)),
            fix((waist, out_size)), fix((1, out_size)),
        ]
        out_spec = pl.BlockSpec((tm, out_size), lambda i: (i, 0))
        out_shape = jax.ShapeDtypeStruct((N, out_size), out_dtype)
        kernel = _concat_combine_kernel_plain
        operands = (h2d, f2d, We_c, be_c, W1h_c, W1f_c, b1_c, W2_c, b2_c)

    weight_bytes = sum(int(a.size) * a.dtype.itemsize for a in operands[2:])
    blk_bytes = tm * (H + F) * 4 + out_blk_rows * lanes * out_itemsize
    # double-buffered I/O blocks + wide f32 epilogue temporaries + margin
    vmem_need = 2 * blk_bytes + 3 * tm * max(lanes, 8) * 4 + weight_bytes + (4 << 20)
    vmem_limit = int(max(16 << 20, min(40 << 20, vmem_need)))

    flops = 2 * N * (F * F + H * waist + F * waist + waist * lanes)
    bytes_accessed = N * (H + F) * 4 + n_out * lanes * out_itemsize + weight_bytes

    out = pl.pallas_call(
        kernel,
        out_shape=out_shape,
        grid_spec=pltpu.PrefetchScalarGridSpec(
            num_scalar_prefetch=0,
            grid=grid,
            in_specs=in_specs,
            out_specs=out_spec,
        ),
        compiler_params=pltpu.CompilerParams(
            dimension_semantics=("parallel",),       # shard row-grid across TCs
            vmem_limit_bytes=vmem_limit),
        cost_estimate=pl.CostEstimate(
            flops=flops, transcendentals=0, bytes_accessed=bytes_accessed),
    )(*operands)

    # Row-major (n_out, pack*out_size) is bit-identical to (n_out*pack, out_size);
    # garbage rows from partial tail blocks live past N and are sliced off here.
    out2d = out.reshape(n_out * pack, out_size)[:N]
    return out2d.reshape(B, S, out_size)


# ----------------------------------------------------------------------------
# Params + reference
# ----------------------------------------------------------------------------
def make_params(key, hidden_size, feature_size, out_size):
    """Deterministic synthetic parameters (pre-transposed PyTorch shapes)."""
    waist = max(hidden_size, feature_size)   # small=False
    ks = jax.random.split(key, 7)
    sc = 0.05
    We  = sc * jax.random.normal(ks[0], (feature_size, feature_size), jnp.float32)
    be  = sc * jax.random.normal(ks[1], (1, feature_size), jnp.float32)
    W1h = sc * jax.random.normal(ks[2], (hidden_size, waist), jnp.float32)
    W1f = sc * jax.random.normal(ks[3], (feature_size, waist), jnp.float32)
    b1  = sc * jax.random.normal(ks[4], (1, waist), jnp.float32)
    W2  = sc * jax.random.normal(ks[5], (waist, out_size), jnp.float32)
    b2  = sc * jax.random.normal(ks[6], (1, out_size), jnp.float32)
    return (We, be, W1h, W1f, b1, W2, b2)


def concat_combine_ref(hidden, features, params):
    """Pure-JAX reference (eval mode), mirroring the kernel's bf16 MXU rounding."""
    We, be, W1h, W1f, b1, W2, b2 = params
    bf = lambda a: a.astype(jnp.bfloat16)
    h, f = bf(hidden), bf(features)
    enr = jnp.dot(f, bf(We), preferred_element_type=jnp.float32) + be
    enr = bf(jnp.maximum(enr, 0.0))
    z1 = (jnp.dot(h, bf(W1h), preferred_element_type=jnp.float32)
          + jnp.dot(enr, bf(W1f), preferred_element_type=jnp.float32) + b1)
    z1 = bf(jnp.maximum(z1, 0.0))
    return jnp.dot(z1, bf(W2), preferred_element_type=jnp.float32) + b2


if __name__ == "__main__":
    hidden_size, feature_size, out_size = 32, 16, 8
    key = jax.random.PRNGKey(0)
    k_p, k1, k2, k3, k4 = jax.random.split(key, 5)
    params = make_params(k_p, hidden_size, feature_size, out_size)

    # Case 1: tiny shape from the module spec (single grid step, partial block).
    B, S = 2, 8
    hidden = jax.random.normal(k1, (B, S, hidden_size), jnp.float32)
    features = jax.random.normal(k2, (B, S, feature_size), jnp.float32)
    ref = concat_combine_ref(hidden, features, params)

    out = jax.block_until_ready(concat_combine(hidden, features, params))
    assert out.shape == (B, S, out_size)
    assert jnp.allclose(out, ref, atol=5e-3, rtol=3e-2), \
        float(jnp.max(jnp.abs(out - ref)))

    # Explicitly exercise the narrow-store fallback (no try/except in hot path).
    out_p = jax.block_until_ready(
        concat_combine(hidden, features, params, lane_dense=False))
    assert jnp.allclose(out_p, ref, atol=5e-3, rtol=3e-2), \
        float(jnp.max(jnp.abs(out_p - ref)))

    # Case 2: ragged row count -> multi-step grid, pipelining, partial tail blocks.
    B2, S2 = 4, 200                        # N = 800 rows, no wrapper-side padding
    hidden2 = jax.random.normal(k3, (B2, S2, hidden_size), jnp.float32)
    features2 = jax.random.normal(k4, (B2, S2, feature_size), jnp.float32)
    out2 = jax.block_until_ready(
        concat_combine(hidden2, features2, params, block_rows=256))
    ref2 = concat_combine_ref(hidden2, features2, params)
    assert out2.shape == (B2, S2, out_size)
    assert jnp.allclose(out2, ref2, atol=5e-3, rtol=3e-2), \
        float(jnp.max(jnp.abs(out2 - ref2)))

    print("KERNEL_OK")
</pallas_src>

<mosaic_0001>
module attributes {stable_mosaic.version = 11 : i64} {
  func.func @_concat_combine_kernel_dense(%arg0: i32, %arg1: memref<128x32xf32, #tpu.memory_space<vmem>>, %arg2: memref<128x16xf32, #tpu.memory_space<vmem>>, %arg3: memref<16x16xbf16, #tpu.memory_space<vmem>>, %arg4: memref<1x16xf32, #tpu.memory_space<vmem>>, %arg5: memref<32x32xbf16, #tpu.memory_space<vmem>>, %arg6: memref<16x32xbf16, #tpu.memory_space<vmem>>, %arg7: memref<1x32xf32, #tpu.memory_space<vmem>>, %arg8: memref<32x128xbf16, #tpu.memory_space<vmem>>, %arg9: memref<1x128xf32, #tpu.memory_space<vmem>>, %arg10: memref<16x128xf32, #tpu.memory_space<vmem>>, %arg11: memref<8x128xf32, #tpu.memory_space<vmem>>) attributes {dimension_semantics = [#tpu.dimension_semantics<parallel>], iteration_bounds = array<i64: 1>, scalar_prefetch = 0 : i64, scratch_operands = 0 : i64, tpu.core_type = #tpu.core_type<tc>, window_params = [{transform_indices = @transform_0, window_bounds = array<i64: 128, 32>}, {transform_indices = @transform_1, window_bounds = array<i64: 128, 16>}, {pipeline_mode = #tpu.pipeline_mode<synchronous>, transform_indices = @transform_2, window_bounds = array<i64: 16, 16>}, {pipeline_mode = #tpu.pipeline_mode<synchronous>, transform_indices = @transform_3, window_bounds = array<i64: 1, 16>}, {pipeline_mode = #tpu.pipeline_mode<synchronous>, transform_indices = @transform_4, window_bounds = array<i64: 32, 32>}, {pipeline_mode = #tpu.pipeline_mode<synchronous>, transform_indices = @transform_5, window_bounds = array<i64: 16, 32>}, {pipeline_mode = #tpu.pipeline_mode<synchronous>, transform_indices = @transform_6, window_bounds = array<i64: 1, 32>}, {pipeline_mode = #tpu.pipeline_mode<synchronous>, transform_indices = @transform_7, window_bounds = array<i64: 32, 128>}, {pipeline_mode = #tpu.pipeline_mode<synchronous>, transform_indices = @transform_8, window_bounds = array<i64: 1, 128>}, {pipeline_mode = #tpu.pipeline_mode<synchronous>, transform_indices = @transform_9, window_bounds = array<i64: 16, 128>}, {transform_indices = @transform_10, window_bounds = array<i64: 8, 128>}]} {
    %c0 = arith.constant 0 : index
    %c0_0 = arith.constant 0 : index
    %0 = vector.load %arg1[%c0, %c0_0] : memref<128x32xf32, #tpu.memory_space<vmem>>, vector<128x32xf32>
    %1 = arith.truncf %0 : vector<128x32xf32> to vector<128x32xbf16>
    %c0_1 = arith.constant 0 : index
    %c0_2 = arith.constant 0 : index
    %2 = vector.load %arg2[%c0_1, %c0_2] : memref<128x16xf32, #tpu.memory_space<vmem>>, vector<128x16xf32>
    %3 = arith.truncf %2 : vector<128x16xf32> to vector<128x16xbf16>
    %c0_3 = arith.constant 0 : index
    %c0_4 = arith.constant 0 : index
    %4 = vector.load %arg3[%c0_3, %c0_4] : memref<16x16xbf16, #tpu.memory_space<vmem>>, vector<16x16xbf16>
    %cst = arith.constant dense<0.000000e+00> : vector<128x16xf32>
    %5 = tpu.matmul %3, %4, %cst {dimension_numbers = #tpu.dot_dimension_numbers<[1], [0], [0], [1], [0, 0, 1, 1], [], []>} : vector<128x16xbf16>, vector<16x16xbf16>, vector<128x16xf32> -> vector<128x16xf32>
    %c0_5 = arith.constant 0 : index
    %c0_6 = arith.constant 0 : index
    %6 = vector.load %arg4[%c0_5, %c0_6] : memref<1x16xf32, #tpu.memory_space<vmem>>, vector<1x16xf32>
    %7 = vector.broadcast %6 : vector<1x16xf32> to vector<128x16xf32>
    %8 = arith.addf %5, %7 : vector<128x16xf32>
    %cst_7 = arith.constant 0.000000e+00 : f32
    %9 = vector.broadcast %cst_7 : f32 to vector<128x16xf32>
    %10 = arith.maximumf %8, %9 : vector<128x16xf32>
    %11 = arith.truncf %10 : vector<128x16xf32> to vector<128x16xbf16>
    %c0_8 = arith.constant 0 : index
    %c0_9 = arith.constant 0 : index
    %12 = vector.load %arg5[%c0_8, %c0_9] : memref<32x32xbf16, #tpu.memory_space<vmem>>, vector<32x32xbf16>
    %cst_10 = arith.constant dense<0.000000e+00> : vector<128x32xf32>
    %13 = tpu.matmul %1, %12, %cst_10 {dimension_numbers = #tpu.dot_dimension_numbers<[1], [0], [0], [1], [0, 0, 1, 1], [], []>} : vector<128x32xbf16>, vector<32x32xbf16>, vector<128x32xf32> -> vector<128x32xf32>
    %c0_11 = arith.constant 0 : index
    %c0_12 = arith.constant 0 : index
    %14 = vector.load %arg6[%c0_11, %c0_12] : memref<16x32xbf16, #tpu.memory_space<vmem>>, vector<16x32xbf16>
    %cst_13 = arith.constant dense<0.000000e+00> : vector<128x32xf32>
    %15 = tpu.matmul %11, %14, %cst_13 {dimension_numbers = #tpu.dot_dimension_numbers<[1], [0], [0], [1], [0, 0, 1, 1], [], []>} : vector<128x16xbf16>, vector<16x32xbf16>, vector<128x32xf32> -> vector<128x32xf32>
    %16 = arith.addf %13, %15 : vector<128x32xf32>
    %c0_14 = arith.constant 0 : index
    %c0_15 = arith.constant 0 : index
    %17 = vector.load %arg7[%c0_14, %c0_15] : memref<1x32xf32, #tpu.memory_space<vmem>>, vector<1x32xf32>
    %18 = vector.broadcast %17 : vector<1x32xf32> to vector<128x32xf32>
    %19 = arith.addf %16, %18 : vector<128x32xf32>
    %cst_16 = arith.constant 0.000000e+00 : f32
    %20 = vector.broadcast %cst_16 : f32 to vector<128x32xf32>
    %21 = arith.maximumf %19, %20 : vector<128x32xf32>
    %22 = arith.truncf %21 : vector<128x32xf32> to vector<128x32xbf16>
    %c0_17 = arith.constant 0 : index
    %c0_18 = arith.constant 0 : index
    %23 = vector.load %arg8[%c0_17, %c0_18] : memref<32x128xbf16, #tpu.memory_space<vmem>>, vector<32x128xbf16>
    %cst_19 = arith.constant dense<0.000000e+00> : vector<128x128xf32>
    %24 = tpu.matmul %22, %23, %cst_19 {dimension_numbers = #tpu.dot_dimension_numbers<[1], [0], [0], [1], [0, 0, 1, 1], [], []>} : vector<128x32xbf16>, vector<32x128xbf16>, vector<128x128xf32> -> vector<128x128xf32>
    %c0_20 = arith.constant 0 : index
    %c0_21 = arith.constant 0 : index
    %25 = vector.load %arg9[%c0_20, %c0_21] : memref<1x128xf32, #tpu.memory_space<vmem>>, vector<1x128xf32>
    %26 = vector.broadcast %25 : vector<1x128xf32> to vector<128x128xf32>
    %27 = arith.addf %24, %26 : vector<128x128xf32>
    %c0_22 = arith.constant 0 : index
    %c0_23 = arith.constant 0 : index
    %28 = vector.load %arg10[%c0_22, %c0_23] : memref<16x128xf32, #tpu.memory_space<vmem>>, vector<16x128xf32>
    %cst_24 = arith.constant 0.000000e+00 : f32
    %29 = vector.broadcast %cst_24 : f32 to vector<16x128xf32>
    %30 = arith.cmpf one, %28, %29 : vector<16x128xf32>
    %31 = vector.shape_cast %27 : vector<128x128xf32> to vector<8x16x128xf32>
    %32 = vector.shape_cast %30 : vector<16x128xi1> to vector<1x16x128xi1>
    %cst_25 = arith.constant 0.000000e+00 : f32
    %33 = vector.shape_cast %32 : vector<1x16x128xi1> to vector<1x16x128xi1>
    %34 = vector.broadcast %33 : vector<1x16x128xi1> to vector<8x16x128xi1>
    %35 = vector.broadcast %cst_25 : f32 to vector<8x16x128xf32>
    %36 = arith.select %34, %31, %35 : vector<8x16x128xi1>, vector<8x16x128xf32>
    %cst_26 = arith.constant dense<0.000000e+00> : vector<8x128xf32>
    %37 = vector.multi_reduction <add>, %36, %cst_26 [1] : vector<8x16x128xf32> to vector<8x128xf32>
    %c0_27 = arith.constant 0 : index
    %c0_28 = arith.constant 0 : index
    %38 = vector.load %arg11[%c0_27, %c0_28] : memref<8x128xf32, #tpu.memory_space<vmem>>, vector<8x128xf32>
    tpu.vector_store %arg11[%c0_27, %c0_28], %37 {strides = array<i32>} : memref<8x128xf32, #tpu.memory_space<vmem>>, vector<8x128xf32>,
    return
  }
  func.func @transform_0(%arg0: i32) -> (i32, i32) {
    %c0_i32 = arith.constant 0 : i32
    %c0_i32_0 = arith.constant 0 : i32
    return %arg0, %c0_i32 : i32, i32
  }
  func.func @transform_1(%arg0: i32) -> (i32, i32) {
    %c0_i32 = arith.constant 0 : i32
    %c0_i32_0 = arith.constant 0 : i32
    return %arg0, %c0_i32 : i32, i32
  }
  func.func @transform_2(%arg0: i32) -> (i32, i32) {
    %c0_i32 = arith.constant 0 : i32
    %c0_i32_0 = arith.constant 0 : i32
    %c0_i32_1 = arith.constant 0 : i32
    return %c0_i32, %c0_i32_0 : i32, i32
  }
  func.func @transform_3(%arg0: i32) -> (i32, i32) {
    %c0_i32 = arith.constant 0 : i32
    %c0_i32_0 = arith.constant 0 : i32
    %c0_i32_1 = arith.constant 0 : i32
    return %c0_i32, %c0_i32_0 : i32, i32
  }
  func.func @transform_4(%arg0: i32) -> (i32, i32) {
    %c0_i32 = arith.constant 0 : i32
    %c0_i32_0 = arith.constant 0 : i32
    %c0_i32_1 = arith.constant 0 : i32
    return %c0_i32, %c0_i32_0 : i32, i32
  }
  func.func @transform_5(%arg0: i32) -> (i32, i32) {
    %c0_i32 = arith.constant 0 : i32
    %c0_i32_0 = arith.constant 0 : i32
    %c0_i32_1 = arith.constant 0 : i32
    return %c0_i32, %c0_i32_0 : i32, i32
  }
  func.func @transform_6(%arg0: i32) -> (i32, i32) {
    %c0_i32 = arith.constant 0 : i32
    %c0_i32_0 = arith.constant 0 : i32
    %c0_i32_1 = arith.constant 0 : i32
    return %c0_i32, %c0_i32_0 : i32, i32
  }
  func.func @transform_7(%arg0: i32) -> (i32, i32) {
    %c0_i32 = arith.constant 0 : i32
    %c0_i32_0 = arith.constant 0 : i32
    %c0_i32_1 = arith.constant 0 : i32
    return %c0_i32, %c0_i32_0 : i32, i32
  }
  func.func @transform_8(%arg0: i32) -> (i32, i32) {
    %c0_i32 = arith.constant 0 : i32
    %c0_i32_0 = arith.constant 0 : i32
    %c0_i32_1 = arith.constant 0 : i32
    return %c0_i32, %c0_i32_0 : i32, i32
  }
  func.func @transform_9(%arg0: i32) -> (i32, i32) {
    %c0_i32 = arith.constant 0 : i32
    %c0_i32_0 = arith.constant 0 : i32
    %c0_i32_1 = arith.constant 0 : i32
    return %c0_i32, %c0_i32_0 : i32, i32
  }
  func.func @transform_10(%arg0: i32) -> (i32, i32) {
    %c0_i32 = arith.constant 0 : i32
    %c0_i32_0 = arith.constant 0 : i32
    return %arg0, %c0_i32 : i32, i32
  }
}

</mosaic_0001>

<bundles_post_ra>
// kernel: concat_combine.1
= control target key start
LH: loop header
LB: loop body
LE: loop exit
PB: predicated region body
PF: predicated region fallthrough
CT: control target
= control target key end

     0   :  { %vm96_vm0 = vcmask 130048   ;;  %vm291_vm1 = vcmask 261120   ;;  %vm590_vm4 = vcmask 1041409   ;;  %vm592_vm5 = vcmask 1042434   ;;  %s1023_s0 = inlined_call_operand.vmem [shape: f32[16,32], index: 0, kind: input, shape index: {}]   ;;  %s1024_s1 = inlined_call_operand.vmem [shape: f32[16,16], index: 1, kind: input, shape index: {}]   ;;  %s1025_s2 = inlined_call_operand.vmem [shape: bf16[16,16], index: 2, kind: input, shape index: {}]   ;;  %s1026_s3 = inlined_call_operand.vmem [shape: f32[1,16], index: 3, kind: input, shape index: {}]   ;;  %s1027_s4 = inlined_call_operand.vmem [shape: bf16[32,32], index: 4, kind: input, shape index: {}]   ;;  %s1028_s5 = inlined_call_operand.vmem [shape: bf16[16,32], index: 5, kind: input, shape index: {}]   ;;  %s1029_s6 = inlined_call_operand.vmem [shape: f32[1,32], index: 6, kind: input, shape index: {}]   ;;  %s1030_s7 = inlined_call_operand.vmem [shape: bf16[32,128], index: 7, kind: input, shape index: {}]   ;;  %s1031_s8 = inlined_call_operand.vmem [shape: f32[1,128], index: 8, kind: input, shape index: {}]   ;;  %s1032_s9 = inlined_call_operand.vmem [shape: f32[16,128], index: 9, kind: input, shape index: {}]   ;;  %s1033_s10 = inlined_call_operand.vmem [shape: f32[1,128], index: 10, kind: output, shape index: {}]  }
   0x1   :  { %v703_v0 = vld [vmem:[%s1025_s2] sm:$0xff]  ;;  %v61_v2 = vld [vmem:[%s1024_s1 + $0x8] sm:$0xff]  ;;  %v62_v4 = vld [vmem:[%s1024_s1 + $0x10] sm:$0xff]  ;;  %vm594_vm6 = vcmask 1043459   ;;  %vm596_vm7 = vcmask 1044484   ;;  %vm598_vm8 = vcmask 1045509  }
   0x2   :  { %v60_v1 = vld [vmem:[%s1024_s1] sm:$0xff]  ;;  %128 = vmatpush.bf16.msra.mxu0 %v703_v0  ;;  %v63_v5 = vld [vmem:[%s1024_s1 + $0x18] sm:$0xff]  ;;  %v65_v8 = vld [vmem:[%s1024_s1 + $0x28] sm:$0xff]  ;;  %vm600_vm9 = vcmask 1046534   ;;  %vm602_vm10 = vcmask 1047559  }
   0x3   :  { %v76_v3 = vpack.c.bf16 %v61_v2, %v60_v1  ;;  %v77_v6 = vpack.c.bf16 %v63_v5, %v62_v4  ;;  %v64_v7 = vld [vmem:[%s1024_s1 + $0x20] sm:$0xff]  ;;  %v66_v10 = vld [vmem:[%s1024_s1 + $0x30] sm:$0xff]  ;;  %v67_v11 = vld [vmem:[%s1024_s1 + $0x38] sm:$0xff] }
   0x4   :  { %v78_v9 = vpack.c.bf16 %v65_v8, %v64_v7  ;;  %v79_v12 = vpack.c.bf16 %v67_v11, %v66_v10  ;;  %v68_v13 = vld [vmem:[%s1024_s1 + $0x40] sm:$0xff]  ;;  %v69_v14 = vld [vmem:[%s1024_s1 + $0x48] sm:$0xff]  ;;  %v70_v16 = vld [vmem:[%s1024_s1 + $0x50] sm:$0xff] }
   0x5   :  { %651 = vmatmul.msk.bf16.vlgmr.msra.gmra.mxu0 %vm96_vm0, %v76_v3  ;;  %v80_v15 = vpack.c.bf16 %v69_v14, %v68_v13  ;;  %v71_v17 = vld [vmem:[%s1024_s1 + $0x58] sm:$0xff]  ;;  %v705_v19 = vld [vmem:[%s1027_s4 + $0x8] sm:$0xff]  ;;  %v704_v20 = vld [vmem:[%s1027_s4] sm:$0xff] }
   0x6   :  { %v81_v18 = vpack.c.bf16 %v71_v17, %v70_v16  ;;  %322 = vmatpush.bf16.msra.mxu2 %v705_v19  ;;  %v72_v21 = vld [vmem:[%s1024_s1 + $0x60] sm:$0xff]  ;;  %v73_v22 = vld [vmem:[%s1024_s1 + $0x68] sm:$0xff]  ;;  %v74_v28 = vld [vmem:[%s1024_s1 + $0x70] sm:$0xff] }
   0x7   :  { %v36_v23 = vld [vmem:[%s1023_s0] sm:$0xff]  ;;  %v37_v24 = vld [vmem:[%s1023_s0 + $0x8] sm:$0xff]  ;;  %v82_v25 = vpack.c.bf16 %v73_v22, %v72_v21  ;;  %v75_v29 = vld [vmem:[%s1024_s1 + $0x78] sm:$0xff] }
   0x8   :  { %v52_v26 = vpack.c.bf16 %v37_v24, %v36_v23  ;;  %v706_v27 = vld [vmem:[%s1028_s5] sm:$0xff]  ;;  %v38_v30 = vld [vmem:[%s1023_s0 + $0x10] sm:$0xff]  ;;  %v39_v31 = vld [vmem:[%s1023_s0 + $0x18] sm:$0xff]  ;;  %v83_v32 = vpack.c.bf16 %v75_v29, %v74_v28 }
   0x9   :  { %237 = vmatpush.bf16.msra.mxu1 %v706_v27  ;;  %v53_v33 = vpack.c.bf16 %v39_v31, %v38_v30  ;;  %v40_v34 = vld [vmem:[%s1023_s0 + $0x20] sm:$0xff]  ;;  %v41_v35 = vld [vmem:[%s1023_s0 + $0x28] sm:$0xff]  ;;  %v42_v45 = vld [vmem:[%s1023_s0 + $0x30] sm:$0xff] }
   0xa   :  { %323 = vmatpush.bf16.msra.mxu2 %v704_v20  ;;  %v54_v36 = vpack.c.bf16 %v41_v35, %v40_v34  ;;  %v859_v38 = vld [vmem:[%s1026_s3] ss:$0 sm:$0xff]  ;;  %v43_v46 = vld [vmem:[%s1023_s0 + $0x38] sm:$0xff]  ;;  %v45_v56 = vld [vmem:[%s1023_s0 + $0x48] sm:$0xff] }
   0xb   :  { %v55_v47 = vpack.c.bf16 %v43_v46, %v42_v45  ;;  %v44_v55 = vld [vmem:[%s1023_s0 + $0x40] sm:$0xff]  ;;  %v46_v1 = vld [vmem:[%s1023_s0 + $0x50] sm:$0xff]  ;;  %v47_v2 = vld [vmem:[%s1023_s0 + $0x58] sm:$0xff] }
   0xc   :  { %v56_v57 = vpack.c.bf16 %v45_v56, %v44_v55  ;;  %v57_v3 = vpack.c.bf16 %v47_v2, %v46_v1  ;;  %v48_v11 = vld [vmem:[%s1023_s0 + $0x60] sm:$0xff]  ;;  %v50_v21 = vld [vmem:[%s1023_s0 + $0x70] sm:$0xff]  ;;  %v51_v22 = vld [vmem:[%s1023_s0 + $0x78] sm:$0xff] }
   0xd   :  { %679 = vmatmul.msk.bf16.vlgmr.msra.gmra.mxu2 %vm291_vm1, %v52_v26  ;;  %v59_v23 = vpack.c.bf16 %v51_v22, %v50_v21  ;;  %v707_v45 = vld [vmem:[%s1030_s7] sm:$0xff] }
  0x15   :  { %652 = vmatmul.msk.bf16.gmra.mxu0 %vm96_vm0, %v77_v6 }
  0x1d   :  { %680 = vmatmul.msk.bf16.gmra.mxu2 %vm291_vm1, %v53_v33 }
  0x25   :  { %653 = vmatmul.msk.bf16.gmra.mxu0 %vm96_vm0, %v78_v9 }
  0x2d   :  { %681 = vmatmul.msk.bf16.gmra.mxu2 %vm291_vm1, %v54_v36 }
  0x35   :  { %654 = vmatmul.msk.bf16.gmra.mxu0 %vm96_vm0, %v79_v12  ;;  %v49_v12 = vld [vmem:[%s1023_s0 + $0x68] sm:$0xff] }
  0x36   :  { %v58_v13 = vpack.c.bf16 %v49_v12, %v48_v11 }
  0x3d   :  { %682 = vmatmul.msk.bf16.gmra.mxu2 %vm291_vm1, %v55_v47 }
  0x45   :  { %655 = vmatmul.msk.bf16.gmra.mxu0 %vm96_vm0, %v80_v15 }
  0x4d   :  { %683 = vmatmul.msk.bf16.gmra.mxu2 %vm291_vm1, %v56_v57 }
  0x55   :  { %656 = vmatmul.msk.bf16.gmra.mxu0 %vm96_vm0, %v81_v18 }
  0x5d   :  { %684 = vmatmul.msk.bf16.gmra.mxu2 %vm291_vm1, %v57_v3 }
  0x65   :  { %657 = vmatmul.msk.bf16.gmra.mxu0 %vm96_vm0, %v82_v25 }
  0x6d   :  { %685 = vmatmul.msk.bf16.gmra.mxu2 %vm291_vm1, %v58_v13 }
  0x75   :  { %658 = vmatmul.msk.bf16.gmra.mxu0 %vm96_vm0, %v83_v32 }
  0x7d   :  { %686 = vmatmul.msk.bf16.gmra.mxu2 %vm291_vm1, %v59_v23 }
  0x82   :  { %v130_v37 = vpop.f32.mrf.mxu0 }
  0x83   :  { %v131_v39 = vadd.f32 %v859_v38, %v130_v37 }
  0x85   :  { %v170_v42 = vmax.f32 %v131_v39, 0.0 }
  0x8a   :  { %v132_v40 = vpop.f32.mrf.mxu0 }
  0x8b   :  { %v133_v41 = vadd.f32 %v859_v38, %v132_v40 }
  0x8d   :  { %v171_v43 = vmax.f32 %v133_v41, 0.0  ;;  %v708_v41 = vld [vmem:[%s1030_s7 + $0x8] sm:$0xff] }
  0x8e   :  { %459 = vmatpush.bf16.msra.mxu3 %v708_v41 }
  0x8f   :  { %v186_v44 = vpack.c.bf16 %v171_v43, %v170_v42 }
  0x90   :  { %v325_v39 = vpop.f32.mrf.mxu2 }
  0x91   :  { %663 = vmatmul.msk.bf16.vlgmr.msra.gmra.mxu1 %vm96_vm0, %v186_v44 }
  0x92   :  { %v135_v48 = vpop.f32.mrf.mxu0  ;;  %460 = vmatpush.bf16.msra.mxu3 %v707_v45 }
  0x93   :  { %v136_v49 = vadd.f32 %v859_v38, %v135_v48 }
  0x95   :  { %v172_v52 = vmax.f32 %v136_v49, 0.0 }
  0x98   :  { %v327_v44 = vpop.f32.mrf.mxu2 }
  0x9a   :  { %v137_v50 = vpop.f32.mrf.mxu0 }
  0x9b   :  { %v138_v51 = vadd.f32 %v859_v38, %v137_v50 }
  0x9d   :  { %v173_v53 = vmax.f32 %v138_v51, 0.0 }
  0x9f   :  { %v187_v54 = vpack.c.bf16 %v173_v53, %v172_v52 }
  0xa0   :  { %v330_v50 = vpop.f32.mrf.mxu2 }
  0xa1   :  { %664 = vmatmul.msk.bf16.gmra.mxu1 %vm96_vm0, %v187_v54  ;;  %v929_v54 = vld [vmem:[%s1029_s6] ss:$0 sm:$0xff] }
  0xa2   :  { %v140_v58 = vpop.f32.mrf.mxu0 }
  0xa3   :  { %v141_v59 = vadd.f32 %v859_v38, %v140_v58 }
  0xa5   :  { %v174_v62 = vmax.f32 %v141_v59, 0.0 }
  0xa8   :  { %v332_v52 = vpop.f32.mrf.mxu2 }
  0xaa   :  { %v142_v60 = vpop.f32.mrf.mxu0 }
  0xab   :  { %v143_v61 = vadd.f32 %v859_v38, %v142_v60 }
  0xad   :  { %v175_v63 = vmax.f32 %v143_v61, 0.0 }
  0xaf   :  { %v188_v0 = vpack.c.bf16 %v175_v63, %v174_v62 }
  0xb1   :  { %665 = vmatmul.msk.bf16.gmra.mxu1 %vm96_vm0, %v188_v0 }
  0xb2   :  { %v145_v4 = vpop.f32.mrf.mxu0 }
  0xb3   :  { %v146_v5 = vadd.f32 %v859_v38, %v145_v4 }
  0xb5   :  { %v176_v8 = vmax.f32 %v146_v5, 0.0 }
  0xba   :  { %v147_v6 = vpop.f32.mrf.mxu0 }
  0xbb   :  { %v148_v7 = vadd.f32 %v859_v38, %v147_v6 }
  0xbd   :  { %v177_v9 = vmax.f32 %v148_v7, 0.0 }
  0xbf   :  { %v189_v10 = vpack.c.bf16 %v177_v9, %v176_v8 }
  0xc1   :  { %666 = vmatmul.msk.bf16.gmra.mxu1 %vm96_vm0, %v189_v10 }
  0xc2   :  { %v150_v14 = vpop.f32.mrf.mxu0 }
  0xc3   :  { %v151_v15 = vadd.f32 %v859_v38, %v150_v14 }
  0xc5   :  { %v178_v18 = vmax.f32 %v151_v15, 0.0 }
  0xca   :  { %v152_v16 = vpop.f32.mrf.mxu0 }
  0xcb   :  { %v153_v17 = vadd.f32 %v859_v38, %v152_v16 }
  0xcd   :  { %v179_v19 = vmax.f32 %v153_v17, 0.0 }
  0xcf   :  { %v190_v20 = vpack.c.bf16 %v179_v19, %v178_v18 }
  0xd1   :  { %667 = vmatmul.msk.bf16.gmra.mxu1 %vm96_vm0, %v190_v20 }
  0xd2   :  { %v155_v24 = vpop.f32.mrf.mxu0 }
  0xd3   :  { %v156_v25 = vadd.f32 %v859_v38, %v155_v24 }
  0xd5   :  { %v180_v28 = vmax.f32 %v156_v25, 0.0 }
  0xda   :  { %v157_v26 = vpop.f32.mrf.mxu0 }
  0xdb   :  { %v158_v27 = vadd.f32 %v859_v38, %v157_v26 }
  0xdd   :  { %v181_v29 = vmax.f32 %v158_v27, 0.0 }
  0xdf   :  { %v191_v30 = vpack.c.bf16 %v181_v29, %v180_v28 }
  0xe1   :  { %668 = vmatmul.msk.bf16.gmra.mxu1 %vm96_vm0, %v191_v30 }
  0xe2   :  { %v160_v31 = vpop.f32.mrf.mxu0 }
  0xe3   :  { %v161_v32 = vadd.f32 %v859_v38, %v160_v31 }
  0xe5   :  { %v182_v35 = vmax.f32 %v161_v32, 0.0 }
  0xea   :  { %v162_v33 = vpop.f32.mrf.mxu0 }
  0xeb   :  { %v163_v34 = vadd.f32 %v859_v38, %v162_v33 }
  0xed   :  { %v183_v36 = vmax.f32 %v163_v34, 0.0 }
  0xef   :  { %v192_v37 = vpack.c.bf16 %v183_v36, %v182_v35 }
  0xf1   :  { %669 = vmatmul.msk.bf16.gmra.mxu1 %vm96_vm0, %v192_v37 }
  0xf2   :  { %v165_v40 = vpop.f32.mrf.mxu0 }
  0xf3   :  { %v166_v42 = vadd.f32 %v859_v38, %v165_v40 }
  0xf5   :  { %v184_v47 = vmax.f32 %v166_v42, 0.0 }
  0xfa   :  { %v167_v43 = vpop.f32.mrf.mxu0 }
  0xfb   :  { %v168_v46 = vadd.f32 %v859_v38, %v167_v43  ;;  %v335_v38 = vpop.f32.mrf.mxu2 }
  0xfd   :  { %v185_v48 = vmax.f32 %v168_v46, 0.0 }
  0xff   :  { %v193_v49 = vpack.c.bf16 %v185_v48, %v184_v47 }
 0x101   :  { %670 = vmatmul.msk.bf16.gmra.mxu1 %vm96_vm0, %v193_v49 }
 0x103   :  { %v337_v63 = vpop.f32.mrf.mxu2 }
 0x10b   :  { %v340_v7 = vpop.f32.mrf.mxu2 }
 0x10e   :  { %v239_v51 = vpop.f32.mrf.mxu1 }
 0x10f   :  { %v326_v53 = vadd.f32 %v325_v39, %v239_v51 }
 0x111   :  { %v369_v56 = vadd.f32 %v929_v54, %v326_v53 }
 0x113   :  { %v385_v59 = vmax.f32 %v369_v56, 0.0  ;;  %v342_v12 = vpop.f32.mrf.mxu2 }
 0x116   :  { %v241_v55 = vpop.f32.mrf.mxu1 }
 0x117   :  { %v328_v57 = vadd.f32 %v327_v44, %v241_v55 }
 0x119   :  { %v370_v58 = vadd.f32 %v929_v54, %v328_v57 }
 0x11b   :  { %v386_v60 = vmax.f32 %v370_v58, 0.0  ;;  %v345_v20 = vpop.f32.mrf.mxu2 }
 0x11d   :  { %v401_v61 = vpack.c.bf16 %v386_v60, %v385_v59 }
 0x11e   :  { %v244_v62 = vpop.f32.mrf.mxu1 }
 0x11f   :  { %695 = vmatmul.msk.bf16.vlgmr.msra.gmra.mxu3 %vm291_vm1, %v401_v61  ;;  %v331_v0 = vadd.f32 %v330_v50, %v244_v62 }
 0x121   :  { %v371_v2 = vadd.f32 %v929_v54, %v331_v0 }
 0x123   :  { %v387_v5 = vmax.f32 %v371_v2, 0.0  ;;  %v347_v26 = vpop.f32.mrf.mxu2 }
 0x126   :  { %v246_v1 = vpop.f32.mrf.mxu1 }
 0x127   :  { %v333_v3 = vadd.f32 %v332_v52, %v246_v1 }
 0x129   :  { %v372_v4 = vadd.f32 %v929_v54, %v333_v3 }
 0x12b   :  { %v388_v6 = vmax.f32 %v372_v4, 0.0  ;;  %v350_v32 = vpop.f32.mrf.mxu2 }
 0x12d   :  { %v402_v8 = vpack.c.bf16 %v388_v6, %v387_v5 }
 0x12e   :  { %v249_v9 = vpop.f32.mrf.mxu1 }
 0x12f   :  { %696 = vmatmul.msk.bf16.gmra.mxu3 %vm291_vm1, %v402_v8  ;;  %v336_v10 = vadd.f32 %v335_v38, %v249_v9 }
 0x131   :  { %v373_v13 = vadd.f32 %v929_v54, %v336_v10  ;;  %v958_v10 = vld [vmem:[%s1031_s8] ss:$0 sm:$0xff] }
 0x133   :  { %v389_v16 = vmax.f32 %v373_v13, 0.0  ;;  %v352_v42 = vpop.f32.mrf.mxu2 }
 0x136   :  { %v251_v11 = vpop.f32.mrf.mxu1 }
 0x137   :  { %v338_v14 = vadd.f32 %v337_v63, %v251_v11  ;;  %v963_v11 = vld [vmem:[%s1032_s9] sm:$0xff] }
 0x138   :  { %vm504_vm2 = vcmp.ne.f32.partialorder %v963_v11, 0.0 }
 0x139   :  { %v374_v15 = vadd.f32 %v929_v54, %v338_v14 }
 0x13b   :  { %v390_v17 = vmax.f32 %v374_v15, 0.0  ;;  %v355_v47 = vpop.f32.mrf.mxu2 }
 0x13d   :  { %v403_v18 = vpack.c.bf16 %v390_v17, %v389_v16 }
 0x13e   :  { %v254_v19 = vpop.f32.mrf.mxu1 }
 0x13f   :  { %697 = vmatmul.msk.bf16.gmra.mxu3 %vm291_vm1, %v403_v18  ;;  %v341_v21 = vadd.f32 %v340_v7, %v254_v19 }
 0x141   :  { %v375_v23 = vadd.f32 %v929_v54, %v341_v21 }
 0x143   :  { %v391_v27 = vmax.f32 %v375_v23, 0.0  ;;  %v357_v53 = vpop.f32.mrf.mxu2 }
 0x146   :  { %v256_v22 = vpop.f32.mrf.mxu1 }
 0x147   :  { %v343_v24 = vadd.f32 %v342_v12, %v256_v22 }
 0x149   :  { %v376_v25 = vadd.f32 %v929_v54, %v343_v24 }
 0x14b   :  { %v392_v28 = vmax.f32 %v376_v25, 0.0  ;;  %v360_v61 = vpop.f32.mrf.mxu2 }
 0x14d   :  { %v404_v29 = vpack.c.bf16 %v392_v28, %v391_v27 }
 0x14e   :  { %v259_v30 = vpop.f32.mrf.mxu1 }
 0x14f   :  { %698 = vmatmul.msk.bf16.gmra.mxu3 %vm291_vm1, %v404_v29  ;;  %v346_v31 = vadd.f32 %v345_v20, %v259_v30 }
 0x151   :  { %v377_v34 = vadd.f32 %v929_v54, %v346_v31 }
 0x153   :  { %v393_v37 = vmax.f32 %v377_v34, 0.0  ;;  %v362_v1 = vpop.f32.mrf.mxu2 }
 0x156   :  { %v261_v33 = vpop.f32.mrf.mxu1 }
 0x157   :  { %v348_v35 = vadd.f32 %v347_v26, %v261_v33 }
 0x159   :  { %v378_v36 = vadd.f32 %v929_v54, %v348_v35 }
 0x15b   :  { %v394_v39 = vmax.f32 %v378_v36, 0.0 }
 0x15d   :  { %v405_v40 = vpack.c.bf16 %v394_v39, %v393_v37 }
 0x15e   :  { %v264_v41 = vpop.f32.mrf.mxu1 }
 0x15f   :  { %699 = vmatmul.msk.bf16.gmra.mxu3 %vm291_vm1, %v405_v40  ;;  %v351_v43 = vadd.f32 %v350_v32, %v264_v41 }
 0x161   :  { %v379_v45 = vadd.f32 %v929_v54, %v351_v43 }
 0x163   :  { %v395_v49 = vmax.f32 %v379_v45, 0.0 }
 0x166   :  { %v266_v44 = vpop.f32.mrf.mxu1 }
 0x167   :  { %v353_v46 = vadd.f32 %v352_v42, %v266_v44 }
 0x169   :  { %v380_v48 = vadd.f32 %v929_v54, %v353_v46 }
 0x16b   :  { %v396_v50 = vmax.f32 %v380_v48, 0.0 }
 0x16d   :  { %v406_v51 = vpack.c.bf16 %v396_v50, %v395_v49 }
 0x16e   :  { %v269_v52 = vpop.f32.mrf.mxu1 }
 0x16f   :  { %700 = vmatmul.msk.bf16.gmra.mxu3 %vm291_vm1, %v406_v51  ;;  %v356_v55 = vadd.f32 %v355_v47, %v269_v52 }
 0x171   :  { %v381_v57 = vadd.f32 %v929_v54, %v356_v55 }
 0x173   :  { %v397_v59 = vmax.f32 %v381_v57, 0.0 }
 0x176   :  { %v271_v56 = vpop.f32.mrf.mxu1 }
 0x177   :  { %v358_v38 = vadd.f32 %v357_v53, %v271_v56 }
 0x179   :  { %v382_v58 = vadd.f32 %v929_v54, %v358_v38 }
 0x17b   :  { %v398_v60 = vmax.f32 %v382_v58, 0.0 }
 0x17d   :  { %v407_v62 = vpack.c.bf16 %v398_v60, %v397_v59 }
 0x17e   :  { %v274_v63 = vpop.f32.mrf.mxu1 }
 0x17f   :  { %701 = vmatmul.msk.bf16.gmra.mxu3 %vm291_vm1, %v407_v62  ;;  %v361_v0 = vadd.f32 %v360_v61, %v274_v63 }
 0x181   :  { %v383_v3 = vadd.f32 %v929_v54, %v361_v0 }
 0x183   :  { %v399_v6 = vmax.f32 %v383_v3, 0.0 }
 0x186   :  { %v276_v2 = vpop.f32.mrf.mxu1 }
 0x187   :  { %v363_v4 = vadd.f32 %v362_v1, %v276_v2 }
 0x189   :  { %v384_v5 = vadd.f32 %v929_v54, %v363_v4  ;;  %v968_v54 = vld [vmem:[%s1032_s9 + $0x8] sm:$0xff] }
 0x18a   :  { %vm505_vm3 = vcmp.ne.f32.partialorder %v968_v54, 0.0 }
 0x18b   :  { %v400_v7 = vmax.f32 %v384_v5, 0.0 }
 0x18d   :  { %v408_v8 = vpack.c.bf16 %v400_v7, %v399_v6 }
 0x18f   :  { %702 = vmatmul.msk.bf16.gmra.mxu3 %vm291_vm1, %v408_v8 }
 0x1a2   :  { %v462_v9 = vpop.f32.mrf.mxu3 }
 0x1a3   :  { %v463_v12 = vadd.f32 %v958_v10, %v462_v9 }
 0x1a5   :  { %v510_v15 = vsel %vm504_vm2, %v463_v12, 0.0 }
 0x1aa   :  { %v464_v13 = vpop.f32.mrf.mxu3 }
 0x1ab   :  { %v465_v14 = vadd.f32 %v958_v10, %v464_v13 }
 0x1ad   :  { %v511_v16 = vsel %vm505_vm3, %v465_v14, 0.0 }
 0x1ae   :  { %v526_v17 = vadd.f32 %v511_v16, %v510_v15 }
 0x1b0   :  { %v527_v19 = vrot.slane %v526_v17, 4 }
 0x1b2   :  { %v467_v18 = vpop.f32.mrf.mxu3  ;;  %v528_v21 = vadd.f32 %v527_v19, %v526_v17 }
 0x1b3   :  { %v468_v20 = vadd.f32 %v958_v10, %v467_v18 }
 0x1b4   :  { %v529_v26 = vrot.slane %v528_v21, 2 }
 0x1b5   :  { %v512_v24 = vsel %vm504_vm2, %v468_v20, 0.0 }
 0x1b6   :  { %v530_v29 = vadd.f32 %v529_v26, %v528_v21 }
 0x1b8   :  { %v531_v33 = vrot.slane %v530_v29, 1 }
 0x1ba   :  { %v469_v22 = vpop.f32.mrf.mxu3  ;;  %v532_v37 = vadd.f32 %v531_v33, %v530_v29 }
 0x1bb   :  { %v470_v23 = vadd.f32 %v958_v10, %v469_v22 }
 0x1bd   :  { %v513_v25 = vsel %vm505_vm3, %v470_v23, 0.0 }
 0x1be   :  { %v533_v27 = vadd.f32 %v513_v25, %v512_v24 }
 0x1c0   :  { %v534_v28 = vrot.slane %v533_v27, 4 }
 0x1c2   :  { %v535_v30 = vadd.f32 %v534_v28, %v533_v27  ;;  %v472_v31 = vpop.f32.mrf.mxu3 }
 0x1c3   :  { %v473_v36 = vadd.f32 %v958_v10, %v472_v31 }
 0x1c4   :  { %v536_v32 = vrot.slane %v535_v30, 2 }
 0x1c5   :  { %v514_v43 = vsel %vm504_vm2, %v473_v36, 0.0 }
 0x1c6   :  { %v537_v34 = vadd.f32 %v536_v32, %v535_v30 }
 0x1c8   :  { %v538_v35 = vrot.slane %v537_v34, 1 }
 0x1ca   :  { %v539_v39 = vadd.f32 %v538_v35, %v537_v34  ;;  %v474_v40 = vpop.f32.mrf.mxu3 }
 0x1cb   :  { %v475_v41 = vadd.f32 %v958_v10, %v474_v40 }
 0x1cc   :  { %v591_v42 = vsel %vm590_vm4, %v539_v39, %v532_v37 }
 0x1cd   :  { %v515_v44 = vsel %vm505_vm3, %v475_v41, 0.0 }
 0x1ce   :  { %v540_v45 = vadd.f32 %v515_v44, %v514_v43 }
 0x1d0   :  { %v541_v46 = vrot.slane %v540_v45, 4 }
 0x1d2   :  { %v542_v47 = vadd.f32 %v541_v46, %v540_v45  ;;  %v477_v48 = vpop.f32.mrf.mxu3 }
 0x1d3   :  { %v478_v52 = vadd.f32 %v958_v10, %v477_v48 }
 0x1d4   :  { %v543_v49 = vrot.slane %v542_v47, 2 }
 0x1d5   :  { %v516_v38 = vsel %vm504_vm2, %v478_v52, 0.0 }
 0x1d6   :  { %v544_v50 = vadd.f32 %v543_v49, %v542_v47 }
 0x1d8   :  { %v545_v51 = vrot.slane %v544_v50, 1 }
 0x1da   :  { %v546_v53 = vadd.f32 %v545_v51, %v544_v50  ;;  %v479_v55 = vpop.f32.mrf.mxu3 }
 0x1db   :  { %v480_v56 = vadd.f32 %v958_v10, %v479_v55 }
 0x1dc   :  { %v593_v57 = vsel %vm592_vm5, %v546_v53, %v591_v42 }
 0x1dd   :  { %v517_v58 = vsel %vm505_vm3, %v480_v56, 0.0 }
 0x1de   :  { %v547_v59 = vadd.f32 %v517_v58, %v516_v38 }
 0x1e0   :  { %v548_v60 = vrot.slane %v547_v59, 4 }
 0x1e2   :  { %v549_v61 = vadd.f32 %v548_v60, %v547_v59  ;;  %v482_v62 = vpop.f32.mrf.mxu3 }
 0x1e3   :  { %v483_v12 = vadd.f32 %v958_v10, %v482_v62 }
 0x1e4   :  { %v550_v63 = vrot.slane %v549_v61, 2 }
 0x1e5   :  { %v518_v19 = vsel %vm504_vm2, %v483_v12, 0.0 }
 0x1e6   :  { %v551_v0 = vadd.f32 %v550_v63, %v549_v61 }
 0x1e8   :  { %v552_v1 = vrot.slane %v551_v0, 1 }
 0x1ea   :  { %v553_v2 = vadd.f32 %v552_v1, %v551_v0  ;;  %v484_v3 = vpop.f32.mrf.mxu3 }
 0x1eb   :  { %v485_v8 = vadd.f32 %v958_v10, %v484_v3 }
 0x1ec   :  { %v595_v4 = vsel %vm594_vm6, %v553_v2, %v593_v57 }
 0x1ed   :  { %v519_v14 = vsel %vm505_vm3, %v485_v8, 0.0 }
 0x1ee   :  { %v554_v20 = vadd.f32 %v519_v14, %v518_v19 }
 0x1f0   :  { %v555_v26 = vrot.slane %v554_v20, 4 }
 0x1f2   :  { %v487_v5 = vpop.f32.mrf.mxu3  ;;  %v556_v30 = vadd.f32 %v555_v26, %v554_v20 }
 0x1f3   :  { %v488_v13 = vadd.f32 %v958_v10, %v487_v5 }
 0x1f4   :  { %v557_v33 = vrot.slane %v556_v30, 2 }
 0x1f5   :  { %v520_v21 = vsel %vm504_vm2, %v488_v13, 0.0 }
 0x1f6   :  { %v558_v40 = vadd.f32 %v557_v33, %v556_v30 }
 0x1f8   :  { %v559_v47 = vrot.slane %v558_v40, 1 }
 0x1fa   :  { %v489_v6 = vpop.f32.mrf.mxu3  ;;  %v560_v52 = vadd.f32 %v559_v47, %v558_v40 }
 0x1fb   :  { %v490_v9 = vadd.f32 %v958_v10, %v489_v6 }
 0x1fc   :  { %v597_v56 = vsel %vm596_vm7, %v560_v52, %v595_v4 }
 0x1fd   :  { %v521_v17 = vsel %vm505_vm3, %v490_v9, 0.0 }
 0x1fe   :  { %v561_v23 = vadd.f32 %v521_v17, %v520_v21 }
 0x200   :  { %v562_v27 = vrot.slane %v561_v23, 4 }
 0x202   :  { %v492_v7 = vpop.f32.mrf.mxu3  ;;  %v563_v31 = vadd.f32 %v562_v27, %v561_v23 }
 0x203   :  { %v493_v15 = vadd.f32 %v958_v10, %v492_v7 }
 0x204   :  { %v564_v35 = vrot.slane %v563_v31, 2 }
 0x205   :  { %v522_v24 = vsel %vm504_vm2, %v493_v15, 0.0 }
 0x206   :  { %v565_v43 = vadd.f32 %v564_v35, %v563_v31 }
 0x208   :  { %v566_v48 = vrot.slane %v565_v43, 1 }
 0x20a   :  { %v494_v16 = vpop.f32.mrf.mxu3  ;;  %v567_v53 = vadd.f32 %v566_v48, %v565_v43 }
 0x20b   :  { %v495_v18 = vadd.f32 %v958_v10, %v494_v16 }
 0x20c   :  { %v599_v54 = vsel %vm598_vm8, %v567_v53, %v597_v56 }
 0x20d   :  { %v523_v22 = vsel %vm505_vm3, %v495_v18, 0.0 }
 0x20e   :  { %v568_v25 = vadd.f32 %v523_v22, %v522_v24 }
 0x210   :  { %v569_v29 = vrot.slane %v568_v25, 4 }
 0x212   :  { %v497_v28 = vpop.f32.mrf.mxu3  ;;  %v570_v32 = vadd.f32 %v569_v29, %v568_v25 }
 0x213   :  { %v498_v34 = vadd.f32 %v958_v10, %v497_v28 }
 0x214   :  { %v571_v37 = vrot.slane %v570_v32, 2 }
 0x215   :  { %v524_v41 = vsel %vm504_vm2, %v498_v34, 0.0 }
 0x216   :  { %v572_v45 = vadd.f32 %v571_v37, %v570_v32 }
 0x218   :  { %v573_v50 = vrot.slane %v572_v45, 1 }
 0x21a   :  { %v499_v36 = vpop.f32.mrf.mxu3  ;;  %v574_v55 = vadd.f32 %v573_v50, %v572_v45 }
 0x21b   :  { %v500_v39 = vadd.f32 %v958_v10, %v499_v36 }
 0x21c   :  { %v601_v38 = vsel %vm600_vm9, %v574_v55, %v599_v54 }
 0x21d   :  { %v525_v42 = vsel %vm505_vm3, %v500_v39, 0.0 }
 0x21e   :  { %v575_v44 = vadd.f32 %v525_v42, %v524_v41 }
 0x220   :  { %v576_v46 = vrot.slane %v575_v44, 4 }
 0x222   :  { %v577_v49 = vadd.f32 %v576_v46, %v575_v44 }
 0x224   :  { %v578_v51 = vrot.slane %v577_v49, 2 }
 0x226   :  { %v579_v10 = vadd.f32 %v578_v51, %v577_v49 }
 0x228   :  { %v580_v11 = vrot.slane %v579_v10, 1 }
 0x22a   :  { %v581_v57 = vadd.f32 %v580_v11, %v579_v10 }
 0x22c   :  { %v603_v58 = vsel %vm602_vm10, %v581_v57, %v601_v38 }
 0x22d   :  { %605 = vst [vmem:[#allocation2] sm:$0xff] %v603_v58 }
 0x234   :  { %v624_v59 = vld [vmem:[#allocation2] sm:$0x1] }
 0x235   :  { %625 = vst [vmem:[%s1033_s10] sm:$0x1] %v624_v59 }

</bundles_post_ra>
